<compile_context>
chip_gen: v7x
topology: tpu7x:2x2x1
jax: 0.10.0
libtpu: 0.0.40
codegen_flags: <defaults>
</compile_context>

<pallas_src>
import functools

import jax
import jax.numpy as jnp
from jax.experimental import pallas as pl
from jax.experimental.pallas import tpu as pltpu


def _round_up(n, m):
    return (n + m - 1) // m * m


def _gelu_tanh(x):
    # PyTorch nn.GELU(approximate='tanh'); tanh lowers to the EUP slot.
    c = 0.7978845608028654  # sqrt(2/pi)
    return 0.5 * x * (1.0 + jnp.tanh(c * (x + 0.044715 * x * x * x)))


def final_layer_kernel(x_ref, g_ref, w1_ref, b1_ref, w2_ref, b2_ref, o_ref,
                       xn_ref, acc_ref, *, eps):
    """Grid = (row tiles, hidden-dim j tiles).  j is the reduction axis."""
    j = pl.program_id(1)
    nj = pl.num_programs(1)

    @pl.when(j == 0)
    def _():
        # RMSNorm in f32: x * rsqrt(mean(x^2, -1) + eps) * gamma, done once per
        # row tile; stored in the MXU dtype so every j step reuses it.
        x = x_ref[...].astype(jnp.float32)                       # (tr, H)
        ms = jnp.mean(x * x, axis=-1, keepdims=True)             # (tr, 1)
        xn = x * jax.lax.rsqrt(ms + eps) * g_ref[...].astype(jnp.float32)
        xn_ref[...] = xn.astype(xn_ref.dtype)
        acc_ref[...] = jnp.zeros_like(acc_ref)

    # fc1 column block + GELU(tanh) in f32, then fc2 row block accumulated
    # into the resident f32 accumulator.  MXU sees the weights' native dtype.
    h = jnp.dot(xn_ref[...], w1_ref[...], preferred_element_type=jnp.float32)
    h = _gelu_tanh(h + b1_ref[...].astype(jnp.float32))          # (tr, tj) f32
    acc_ref[...] += jnp.dot(h.astype(w2_ref.dtype), w2_ref[...],
                            preferred_element_type=jnp.float32)

    @pl.when(j == nj - 1)
    def _():
        o_ref[...] = (acc_ref[...]
                      + b2_ref[...].astype(jnp.float32)).astype(o_ref.dtype)


def _const_spec(block_shape, index_map):
    # Grid-invariant operand (gamma, fc2 bias): single-buffer it if the
    # installed Pallas supports pipeline_mode (both operands are tiny anyway).
    try:
        return pl.BlockSpec(block_shape, index_map, pipeline_mode=pl.Buffered(1))
    except TypeError:  # older Pallas without pipeline_mode: default buffering.
        return pl.BlockSpec(block_shape, index_map)


def _pick_hidden_tile(H, target=512):
    """Largest multiple of 128 <= target that divides H, else the whole H."""
    tj = (min(target, H) // 128) * 128
    while tj >= 128:
        if H % tj == 0:
            return tj
        tj -= 128
    return H


def final_layer(x, gamma, w1, b1, w2, b2, *, eps=1e-6, tile_rows=None,
                tile_hidden=512, mxu_dtype=jnp.bfloat16):
    """x: (B, T, H) -> (B, T, out_channels). Matches FinalLayer.forward."""
    B, T, H = x.shape
    O = w2.shape[1]
    N = B * T
    x2 = x.reshape(N, H)

    # Feed the MXU bf16 weights (3x+ throughput, half VMEM).  mxu_dtype=None
    # keeps the exact f32 path.
    if mxu_dtype is not None and w1.dtype == jnp.float32:
        w1 = w1.astype(mxu_dtype)
    if mxu_dtype is not None and w2.dtype == jnp.float32:
        w2 = w2.astype(mxu_dtype)

    # Output padding only when O is large and misaligned; small O (e.g. 16-64)
    # uses native masked stores instead of 8x write amplification + a slice.
    if O % 128 != 0 and O > 256:
        Op = _round_up(O, 128)
        w2p = jnp.pad(w2, ((0, 0), (0, Op - O)))
        b2p = jnp.pad(b2, ((0, Op - O),))
    else:
        Op, w2p, b2p = O, w2, b2

    g2 = gamma.reshape(1, H)
    b1_2 = b1.reshape(1, H)
    b2_2 = b2p.reshape(1, Op)

    # Device VMEM capacity (per TensorCore); conservative fallback = v7x 64 MiB.
    try:
        vmem_cap = int(pltpu.get_tpu_info().vmem_capacity_bytes)
    except Exception:
        vmem_cap = 64 * 1024 * 1024

    if tile_rows is None:
        tile_rows = 512 if vmem_cap >= 100 * 1024 * 1024 else 256
    tr = max(8, min(tile_rows, _round_up(N, 8)))
    tj = _pick_hidden_tile(H, tile_hidden)

    itx = x.dtype.itemsize
    itw = w1.dtype.itemsize
    itw2 = w2p.dtype.itemsize

    def _need(tr_):
        return (2 * tr_ * H * itx          # x row tile (double-buffered)
                + 2 * H * tj * itw         # fc1 weight column block
                + 2 * tj * Op * itw2       # fc2 weight row block
                + 2 * tr_ * Op * itx       # output row tile
                + tr_ * H * itw            # xn scratch (MXU dtype)
                + tr_ * Op * 4             # fc2 f32 accumulator scratch
                + 2 * tr_ * max(tj, 128) * 4   # live f32 (tr, tj) intermediates
                + 16 * (2 * H + tj + Op))  # gamma / b1 / b2 blocks

    # Shrink the row tile if the footprint would not fit the device (v7x).
    while tr > 64 and _need(tr) + (4 << 20) > 0.85 * vmem_cap:
        tr = max(64, _round_up(tr // 2, 8))
    need = _need(tr)
    vmem_limit = int(min(0.85 * vmem_cap,
                         max(16 << 20, need + max(need // 8, 4 << 20))))

    grid = (pl.cdiv(N, tr), H // tj)

    cost = pl.CostEstimate(
        flops=2 * N * H * (H + Op),
        transcendentals=N * H,
        bytes_accessed=(N * H * itx + N * Op * itx
                        + w1.size * itw + w2p.size * itw2
                        + (2 * H + Op) * 4),
    )

    out = pl.pallas_call(
        functools.partial(final_layer_kernel, eps=eps),
        out_shape=jax.ShapeDtypeStruct((N, Op), x.dtype),
        grid_spec=pltpu.PrefetchScalarGridSpec(
            num_scalar_prefetch=0,
            grid=grid,
            in_specs=[
                pl.BlockSpec((tr, H), lambda i, j: (i, 0)),    # x rows (re-DMA'd only when i changes)
                _const_spec((1, H), lambda i, j: (0, 0)),      # rmsnorm gamma
                pl.BlockSpec((H, tj), lambda i, j: (0, j)),    # fc1 weight column block
                pl.BlockSpec((1, tj), lambda i, j: (0, j)),    # fc1 bias block
                pl.BlockSpec((tj, Op), lambda i, j: (j, 0)),   # fc2 weight row block
                _const_spec((1, Op), lambda i, j: (0, 0)),     # fc2 bias
            ],
            out_specs=pl.BlockSpec((tr, Op), lambda i, j: (i, 0)),
            scratch_shapes=[
                pltpu.VMEM((tr, H), w1.dtype),      # xn (RMSNorm output, MXU dtype)
                pltpu.VMEM((tr, Op), jnp.float32),  # fc2 accumulator
            ],
        ),
        compiler_params=pltpu.CompilerParams(
            dimension_semantics=("parallel", "arbitrary"),
            vmem_limit_bytes=vmem_limit),
        cost_estimate=cost,
    )(x2, g2, w1, b1_2, w2p, b2_2)

    if Op != O:
        out = out[:, :O]
    return out.reshape(B, T, O)


def reference(x, gamma, w1, b1, w2, b2, eps=1e-6):
    x32 = x.astype(jnp.float32)
    ms = jnp.mean(x32 * x32, axis=-1, keepdims=True)
    xn = x32 * jax.lax.rsqrt(ms + eps) * gamma
    h = _gelu_tanh(xn @ w1 + b1)
    return (h @ w2 + b2).astype(x.dtype)


if __name__ == "__main__":
    B, T, H, OUT = 2, 8, 32, 16

    key = jax.random.PRNGKey(0)
    kx, kg, kw1, kb1, kw2, kb2 = jax.random.split(key, 6)

    x = jax.random.normal(kx, (B, T, H), dtype=jnp.float32)
    # Deterministic synthetic parameters (shapes follow the module __init__):
    gamma = 1.0 + 0.01 * jax.random.normal(kg, (H,), dtype=jnp.float32)   # RmsNorm weight
    w1 = 0.02 * jax.random.normal(kw1, (H, H), dtype=jnp.float32)         # fc1 weight (in, hidden)
    b1 = 0.01 * jax.random.normal(kb1, (H,), dtype=jnp.float32)           # fc1 bias
    w2 = 0.02 * jax.random.normal(kw2, (H, OUT), dtype=jnp.float32)       # fc2 weight (hidden, out)
    b2 = 0.01 * jax.random.normal(kb2, (OUT,), dtype=jnp.float32)         # fc2 bias

    ref = reference(x, gamma, w1, b1, w2, b2)

    # Exact f32 MXU path: tight tolerance against the pure-f32 reference.
    out_f32 = jax.block_until_ready(final_layer(x, gamma, w1, b1, w2, b2, mxu_dtype=None))
    assert out_f32.shape == (B, T, OUT), out_f32.shape
    assert jnp.allclose(out_f32, ref, atol=1e-5, rtol=1e-5), \
        float(jnp.max(jnp.abs(out_f32 - ref)))

    # Default production path (bf16 weights on the MXU): looser tolerance.
    out_bf = jax.block_until_ready(final_layer(x, gamma, w1, b1, w2, b2))
    assert out_bf.shape == (B, T, OUT), out_bf.shape
    assert jnp.allclose(out_bf, ref, atol=2e-2, rtol=2e-2), \
        float(jnp.max(jnp.abs(out_bf - ref)))

    # Ragged row count (N not a multiple of 8/row tile) exercises the cdiv grid
    # + masked-store path that replaced the wrapper-side pad/slice.
    x3 = jax.random.normal(kx, (3, 5, H), dtype=jnp.float32)
    out3 = jax.block_until_ready(final_layer(x3, gamma, w1, b1, w2, b2, mxu_dtype=None))
    ref3 = reference(x3, gamma, w1, b1, w2, b2)
    assert out3.shape == (3, 5, OUT), out3.shape
    assert jnp.allclose(out3, ref3, atol=1e-5, rtol=1e-5), \
        float(jnp.max(jnp.abs(out3 - ref3)))

    print("KERNEL_OK")
</pallas_src>

<mosaic_0001>
module attributes {stable_mosaic.version = 11 : i64} {
  func.func @final_layer_kernel(%arg0: i32, %arg1: i32, %arg2: memref<16x32xf32, #tpu.memory_space<vmem>>, %arg3: memref<1x32xf32, #tpu.memory_space<vmem>>, %arg4: memref<32x32xf32, #tpu.memory_space<vmem>>, %arg5: memref<1x32xf32, #tpu.memory_space<vmem>>, %arg6: memref<32x16xf32, #tpu.memory_space<vmem>>, %arg7: memref<1x16xf32, #tpu.memory_space<vmem>>, %arg8: memref<16x16xf32, #tpu.memory_space<vmem>>, %arg9: memref<16x32xf32, #tpu.memory_space<vmem>>, %arg10: memref<16x16xf32, #tpu.memory_space<vmem>>) attributes {dimension_semantics = [#tpu.dimension_semantics<parallel>, #tpu.dimension_semantics<arbitrary>], iteration_bounds = array<i64: 1, 1>, scalar_prefetch = 0 : i64, scratch_operands = 2 : i64, tpu.core_type = #tpu.core_type<tc>, window_params = [{transform_indices = @transform_0, window_bounds = array<i64: 16, 32>}, {pipeline_mode = #tpu.pipeline_mode<synchronous>, transform_indices = @transform_1, window_bounds = array<i64: 1, 32>}, {transform_indices = @transform_2, window_bounds = array<i64: 32, 32>}, {transform_indices = @transform_3, window_bounds = array<i64: 1, 32>}, {transform_indices = @transform_4, window_bounds = array<i64: 32, 16>}, {pipeline_mode = #tpu.pipeline_mode<synchronous>, transform_indices = @transform_5, window_bounds = array<i64: 1, 16>}, {transform_indices = @transform_6, window_bounds = array<i64: 16, 16>}]} {
    %c0_i32 = arith.constant 0 : i32
    %0 = arith.cmpi eq, %arg1, %c0_i32 : i32
    %1 = arith.extui %0 : i1 to i32
    %c0_i32_0 = arith.constant 0 : i32
    %2 = arith.cmpi ne, %1, %c0_i32_0 : i32
    scf.if %2 {
      %c0_19 = arith.constant 0 : index
      %c0_20 = arith.constant 0 : index
      %30 = vector.load %arg2[%c0_19, %c0_20] : memref<16x32xf32, #tpu.memory_space<vmem>>, vector<16x32xf32>
      %31 = arith.mulf %30, %30 : vector<16x32xf32>
      %cst_21 = arith.constant dense<0.000000e+00> : vector<16xf32>
      %32 = vector.multi_reduction <add>, %31, %cst_21 [1] : vector<16x32xf32> to vector<16xf32>
      %33 = vector.shape_cast %32 : vector<16xf32> to vector<16x1xf32>
      %cst_22 = arith.constant 3.200000e+01 : f32
      %34 = vector.broadcast %cst_22 : f32 to vector<16x1xf32>
      %35 = arith.divf %33, %34 : vector<16x1xf32>
      %cst_23 = arith.constant 9.99999997E-7 : f32
      %36 = vector.broadcast %cst_23 : f32 to vector<16x1xf32>
      %37 = arith.addf %35, %36 : vector<16x1xf32>
      %38 = math.rsqrt %37 : vector<16x1xf32>
      %39 = vector.broadcast %38 : vector<16x1xf32> to vector<16x32xf32>
      %40 = arith.mulf %30, %39 : vector<16x32xf32>
      %c0_24 = arith.constant 0 : index
      %c0_25 = arith.constant 0 : index
      %41 = vector.load %arg3[%c0_24, %c0_25] : memref<1x32xf32, #tpu.memory_space<vmem>>, vector<1x32xf32>
      %42 = vector.broadcast %41 : vector<1x32xf32> to vector<16x32xf32>
      %43 = arith.mulf %40, %42 : vector<16x32xf32>
      %c0_26 = arith.constant 0 : index
      %c0_27 = arith.constant 0 : index
      %44 = vector.load %arg9[%c0_26, %c0_27] : memref<16x32xf32, #tpu.memory_space<vmem>>, vector<16x32xf32>
      tpu.vector_store %arg9[%c0_26, %c0_27], %43 {strides = array<i32>} : memref<16x32xf32, #tpu.memory_space<vmem>>, vector<16x32xf32>,
      %cst_28 = arith.constant 0.000000e+00 : f32
      %45 = vector.broadcast %cst_28 : f32 to vector<16x16xf32>
      %c0_29 = arith.constant 0 : index
      %c0_30 = arith.constant 0 : index
      %46 = vector.load %arg10[%c0_29, %c0_30] : memref<16x16xf32, #tpu.memory_space<vmem>>, vector<16x16xf32>
      tpu.vector_store %arg10[%c0_29, %c0_30], %45 {strides = array<i32>} : memref<16x16xf32, #tpu.memory_space<vmem>>, vector<16x16xf32>,
    } else {
    }
    %c0 = arith.constant 0 : index
    %c0_1 = arith.constant 0 : index
    %3 = vector.load %arg9[%c0, %c0_1] : memref<16x32xf32, #tpu.memory_space<vmem>>, vector<16x32xf32>
    %c0_2 = arith.constant 0 : index
    %c0_3 = arith.constant 0 : index
    %4 = vector.load %arg4[%c0_2, %c0_3] : memref<32x32xf32, #tpu.memory_space<vmem>>, vector<32x32xf32>
    %cst = arith.constant dense<0.000000e+00> : vector<16x32xf32>
    %5 = tpu.matmul %3, %4, %cst {dimension_numbers = #tpu.dot_dimension_numbers<[1], [0], [0], [1], [0, 0, 1, 1], [], []>} : vector<16x32xf32>, vector<32x32xf32>, vector<16x32xf32> -> vector<16x32xf32>
    %c0_4 = arith.constant 0 : index
    %c0_5 = arith.constant 0 : index
    %6 = vector.load %arg5[%c0_4, %c0_5] : memref<1x32xf32, #tpu.memory_space<vmem>>, vector<1x32xf32>
    %7 = vector.broadcast %6 : vector<1x32xf32> to vector<16x32xf32>
    %8 = arith.addf %5, %7 : vector<16x32xf32>
    %cst_6 = arith.constant 5.000000e-01 : f32
    %9 = vector.broadcast %cst_6 : f32 to vector<16x32xf32>
    %10 = arith.mulf %9, %8 : vector<16x32xf32>
    %cst_7 = arith.constant 4.471500e-02 : f32
    %11 = vector.broadcast %cst_7 : f32 to vector<16x32xf32>
    %12 = arith.mulf %11, %8 : vector<16x32xf32>
    %13 = arith.mulf %12, %8 : vector<16x32xf32>
    %14 = arith.mulf %13, %8 : vector<16x32xf32>
    %15 = arith.addf %8, %14 : vector<16x32xf32>
    %cst_8 = arith.constant 0.797884583 : f32
    %16 = vector.broadcast %cst_8 : f32 to vector<16x32xf32>
    %17 = arith.mulf %16, %15 : vector<16x32xf32>
    %18 = math.tanh %17 : vector<16x32xf32>
    %cst_9 = arith.constant 1.000000e+00 : f32
    %19 = vector.broadcast %cst_9 : f32 to vector<16x32xf32>
    %20 = arith.addf %19, %18 : vector<16x32xf32>
    %21 = arith.mulf %10, %20 : vector<16x32xf32>
    %c0_10 = arith.constant 0 : index
    %c0_11 = arith.constant 0 : index
    %22 = vector.load %arg10[%c0_10, %c0_11] : memref<16x16xf32, #tpu.memory_space<vmem>>, vector<16x16xf32>
    %c0_12 = arith.constant 0 : index
    %c0_13 = arith.constant 0 : index
    %23 = vector.load %arg6[%c0_12, %c0_13] : memref<32x16xf32, #tpu.memory_space<vmem>>, vector<32x16xf32>
    %cst_14 = arith.constant dense<0.000000e+00> : vector<16x16xf32>
    %24 = tpu.matmul %21, %23, %cst_14 {dimension_numbers = #tpu.dot_dimension_numbers<[1], [0], [0], [1], [0, 0, 1, 1], [], []>} : vector<16x32xf32>, vector<32x16xf32>, vector<16x16xf32> -> vector<16x16xf32>
    %25 = arith.addf %22, %24 : vector<16x16xf32>
    %c0_15 = arith.constant 0 : index
    %c0_16 = arith.constant 0 : index
    %26 = vector.load %arg10[%c0_15, %c0_16] : memref<16x16xf32, #tpu.memory_space<vmem>>, vector<16x16xf32>
    tpu.vector_store %arg10[%c0_15, %c0_16], %25 {strides = array<i32>} : memref<16x16xf32, #tpu.memory_space<vmem>>, vector<16x16xf32>,
    %c0_i32_17 = arith.constant 0 : i32
    %27 = arith.cmpi eq, %arg1, %c0_i32_17 : i32
    %28 = arith.extui %27 : i1 to i32
    %c0_i32_18 = arith.constant 0 : i32
    %29 = arith.cmpi ne, %28, %c0_i32_18 : i32
    scf.if %29 {
      %c0_19 = arith.constant 0 : index
      %c0_20 = arith.constant 0 : index
      %30 = vector.load %arg10[%c0_19, %c0_20] : memref<16x16xf32, #tpu.memory_space<vmem>>, vector<16x16xf32>
      %c0_21 = arith.constant 0 : index
      %c0_22 = arith.constant 0 : index
      %31 = vector.load %arg7[%c0_21, %c0_22] : memref<1x16xf32, #tpu.memory_space<vmem>>, vector<1x16xf32>
      %32 = vector.broadcast %31 : vector<1x16xf32> to vector<16x16xf32>
      %33 = arith.addf %30, %32 : vector<16x16xf32>
      %c0_23 = arith.constant 0 : index
      %c0_24 = arith.constant 0 : index
      %34 = vector.load %arg8[%c0_23, %c0_24] : memref<16x16xf32, #tpu.memory_space<vmem>>, vector<16x16xf32>
      tpu.vector_store %arg8[%c0_23, %c0_24], %33 {strides = array<i32>} : memref<16x16xf32, #tpu.memory_space<vmem>>, vector<16x16xf32>,
    } else {
    }
    return
  }
  func.func @transform_0(%arg0: i32, %arg1: i32) -> (i32, i32) {
    %c0_i32 = arith.constant 0 : i32
    %c0_i32_0 = arith.constant 0 : i32
    return %arg0, %c0_i32 : i32, i32
  }
  func.func @transform_1(%arg0: i32, %arg1: i32) -> (i32, i32) {
    %c0_i32 = arith.constant 0 : i32
    %c0_i32_0 = arith.constant 0 : i32
    %c0_i32_1 = arith.constant 0 : i32
    return %c0_i32, %c0_i32_0 : i32, i32
  }
  func.func @transform_2(%arg0: i32, %arg1: i32) -> (i32, i32) {
    %c0_i32 = arith.constant 0 : i32
    %c0_i32_0 = arith.constant 0 : i32
    return %c0_i32, %arg1 : i32, i32
  }
  func.func @transform_3(%arg0: i32, %arg1: i32) -> (i32, i32) {
    %c0_i32 = arith.constant 0 : i32
    %c0_i32_0 = arith.constant 0 : i32
    return %c0_i32, %arg1 : i32, i32
  }
  func.func @transform_4(%arg0: i32, %arg1: i32) -> (i32, i32) {
    %c0_i32 = arith.constant 0 : i32
    %c0_i32_0 = arith.constant 0 : i32
    return %arg1, %c0_i32 : i32, i32
  }
  func.func @transform_5(%arg0: i32, %arg1: i32) -> (i32, i32) {
    %c0_i32 = arith.constant 0 : i32
    %c0_i32_0 = arith.constant 0 : i32
    %c0_i32_1 = arith.constant 0 : i32
    return %c0_i32, %c0_i32_0 : i32, i32
  }
  func.func @transform_6(%arg0: i32, %arg1: i32) -> (i32, i32) {
    %c0_i32 = arith.constant 0 : i32
    %c0_i32_0 = arith.constant 0 : i32
    return %arg0, %c0_i32 : i32, i32
  }
}

</mosaic_0001>

<bundles_post_ra>
// kernel: tpu_custom_call.1
= control target key start
LH: loop header
LB: loop body
LE: loop exit
PB: predicated region body
PF: predicated region fallthrough
CT: control target
= control target key end

     0   :  { %vm32_vm0 = vcmask 261120   ;;  %s496_s0 = inlined_call_operand.vmem [shape: f32[16,32], index: 0, kind: input, shape index: {}]   ;;  %s497_s1 = inlined_call_operand.vmem [shape: f32[1,32], index: 1, kind: input, shape index: {}]   ;;  %s498_s2 = inlined_call_operand.vmem [shape: f32[32,32], index: 2, kind: input, shape index: {}]   ;;  %s499_s3 = inlined_call_operand.vmem [shape: f32[1,32], index: 3, kind: input, shape index: {}]   ;;  %s500_s4 = inlined_call_operand.vmem [shape: f32[32,16], index: 4, kind: input, shape index: {}]   ;;  %s501_s5 = inlined_call_operand.vmem [shape: f32[1,16], index: 5, kind: input, shape index: {}]   ;;  %s502_s6 = inlined_call_operand.hbm [shape: f32[16,16], index: 6, kind: output, shape index: {}]  }
   0x1   :  { %v28_v0 = vld [vmem:[%s496_s0] sm:$0xff]  ;;  %v29_v1 = vld [vmem:[%s496_s0 + $0x8] sm:$0xff] }
   0x2   :  { %v30_v2 = vmul.f32 %v28_v0, %v28_v0  ;;  %v31_v3 = vmul.f32 %v29_v1, %v29_v1 }
   0x3   :  { %11 = vsyncpa [#allocation5], 0  ;;  %v64_v6 = vld [vmem:[%s498_s2] sm:$0xff]  ;;  %v65_v7 = vld [vmem:[%s498_s2 + $0x8] sm:$0xff]  ;;  %vm59_vm1 = vcmask 130048   ;;  %v392_v33 = vmov 0.0  }
   0x4   :  { %v33_v4 = vsel %vm32_vm0, %v30_v2, 0.0  ;;  %v36_v5 = vsel %vm32_vm0, %v31_v3, 0.0  ;;  %v340_v8 = vpack.c.bf16 %v65_v7, %v64_v6  ;;  %v66_v9 = vld [vmem:[%s498_s2 + $0x10] sm:$0xff]  ;;  %v67_v10 = vld [vmem:[%s498_s2 + $0x18] sm:$0xff]  ;;  %v299_v19 = vld [vmem:[%s497_s1] ss:$0 sm:$0xff] }
   0x5   :  { %34 = vadd.xlane.f32.xlu0 %v33_v4  ;;  %v344_v11 = vpack.c.bf16 %v67_v10, %v66_v9  ;;  %v177_v27 = vld [vmem:[%s500_s4] sm:$0xff]  ;;  %v178_v28 = vld [vmem:[%s500_s4 + $0x8] sm:$0xff]  ;;  %v179_v29 = vld [vmem:[%s500_s4 + $0x10] sm:$0xff]  ;;  %61 = vst.msk [vmem:[#allocation3 + $0x8] sm:$0xff] %vm59_vm1, %v392_v33  ;;  %s393_s18 = smov [#allocation4]  }
   0x6   :  { %341 = vmatprep.subr.bf16.mxu0 %v340_v8  ;;  %v348_v30 = vpack.c.bf16 %v178_v28, %v177_v27  ;;  %v180_v31 = vld [vmem:[%s500_s4 + $0x18] sm:$0xff]  ;;  %60 = vst.msk [vmem:[#allocation3] sm:$0xff] %vm59_vm1, %v392_v33  ;;  %v300_v34 = vld [vmem:[%s499_s3] ss:$0 sm:$0xff]  ;;  %s288_s19 = sshll.u32 %s393_s18, 4  ;;  %s289_s19 = int_to_ptr.vmem [resolvable:$true] %s288_s19 }
   0x7   :  { %343 = vmatpush3.bf16.msra.mxu0 %v340_v8  ;;  %v352_v32 = vpack.c.bf16 %v180_v31, %v179_v29  ;;  %v305_v63 = vld [vmem:[%s501_s5] ss:$0 sm:$0xff]  ;;  %s368_s20 = scalar_lea.vmem %s289_s19, 256  ;;  %p373_p1 = scmp.lt.s32.totalorder %s289_s19, %s289_s19 }
   0x8   :  { %345 = vmatprep.subr.bf16.mxu0 %v344_v11  ;;  %349 = vmatprep.subr.bf16.mxu1 %v348_v30  ;;  %p369_p0 = scmp.ne.s32.totalorder %s289_s19, %s368_s20  ;;  %p374_p2 = scmp.lt.s32.totalorder %s368_s20, %s368_s20 }
   0x9   :  { %37 = vadd.xlane.f32.xlu0 %v36_v5  ;;  %351 = vmatpush3.bf16.msra.mxu1 %v348_v30 }
   0xa   :  { %353 = vmatprep.subr.bf16.mxu1 %v352_v32  ;;  %p375_p3 = por %p374_p2, %p373_p1 }
   0xb   :  { %347 = vmatpush3.bf16.msra.mxu0 %v344_v11 }
   0xc   :  { %v176_v57 = vld [vmem:[#allocation3 + $0x8] sm:$0xff]  ;;  %p376_p4 = pnand %p375_p3, %p369_p0 }
   0xd   :  { %355 = vmatpush3.bf16.msra.mxu1 %v352_v32  ;;  %v175_v58 = vld [vmem:[#allocation3] sm:$0xff] }
  0x92   :  { %v35_v12 = vpop.xlane.xlu0 %34 }
  0x93   :  { %v40_v13 = vmul.f32 0.03125, %v35_v12 }
  0x95   :  { %v42_v14 = vadd.f32 1e-06, %v40_v13 }
  0x96   :  { %v38_v15 = vpop.xlane.xlu0 %37 }
  0x97   :  { %360 = vrsqrt.f32 %v42_v14  ;;  %v41_v16 = vmul.f32 0.03125, %v38_v15 }
  0x99   :  { %v43_v17 = vadd.f32 1e-06, %v41_v16 }
  0x9b   :  { %362 = vrsqrt.f32 %v43_v17 }
  0xa1   :  { %v361_v18 = vpop.eup %360 }
  0xa2   :  { %v46_v20 = vmul.f32 %v361_v18, %v28_v0 }
  0xa4   :  { %v55_v21 = vmul.f32 %v299_v19, %v46_v20 }
  0xa5   :  { %v363_v22 = vpop.eup %362 }
  0xa6   :  { %57 = vst.msk [vmem:[#allocation2] sm:$0xff] %vm32_vm0, %v55_v21  ;;  %v47_v23 = vmul.f32 %v363_v22, %v29_v1 }
  0xa8   :  { %v56_v24 = vmul.f32 %v299_v19, %v47_v23 }
  0xaa   :  { %58 = vst.msk [vmem:[#allocation2 + $0x8] sm:$0xff] %vm32_vm0, %v56_v24 }
  0xad   :  { %v62_v25 = vld [vmem:[#allocation2] sm:$0xff] }
  0xae   :  { %326 = vmatprep.mubr.msk.f32.mxu0 %vm32_vm0, %v62_v25 }
  0xb1   :  { %v63_v26 = vld [vmem:[#allocation2 + $0x8] sm:$0xff] }
  0xb2   :  { %327 = vmatmul.mubr.msk.f32.vlgmr.msra.gmra.mrb[0].mxu0 %vm32_vm0, %v63_v26 }
 0x185   :  { %v328_v35 = vpop.f32.mrb[0].mxu0 }
 0x186   :  { %v154_v36 = vadd.f32 %v328_v35, %v300_v34  ;;  %v148_v37 = vpop.f32.mrb[1].mxu0 }
 0x187   :  { %v149_v38 = vadd.f32 %v300_v34, %v148_v37 }
 0x188   :  { %v160_v39 = vmul.f32 0.044715, %v154_v36  ;;  %v158_v54 = vmul.f32 0.5, %v154_v36 }
 0x189   :  { %v159_v40 = vmul.f32 0.044715, %v149_v38  ;;  %v157_v52 = vmul.f32 0.5, %v149_v38 }
 0x18a   :  { %v162_v41 = vmul.f32 %v160_v39, %v154_v36 }
 0x18b   :  { %v161_v42 = vmul.f32 %v159_v40, %v149_v38 }
 0x18c   :  { %v164_v43 = vmul.f32 %v162_v41, %v154_v36 }
 0x18d   :  { %v163_v44 = vmul.f32 %v161_v42, %v149_v38 }
 0x18e   :  { %v166_v45 = vadd.f32 %v164_v43, %v154_v36 }
 0x18f   :  { %v165_v46 = vadd.f32 %v163_v44, %v149_v38 }
 0x190   :  { %v168_v47 = vmul.f32 0.7978846, %v166_v45 }
 0x191   :  { %v167_v48 = vmul.f32 0.7978846, %v165_v46 }
 0x192   :  { %364 = vtanh.f32 %v168_v47 }
 0x193   :  { %366 = vtanh.f32 %v167_v48 }
 0x19c   :  { %v365_v49 = vpop.eup %364 }
 0x19d   :  { %v367_v50 = vpop.eup %366  ;;  %v172_v51 = vadd.f32 1.0, %v365_v49 }
 0x19e   :  { %v171_v53 = vadd.f32 1.0, %v367_v50 }
 0x19f   :  { %v174_v56 = vmul.f32 %v172_v51, %v158_v54 }
 0x1a0   :  { %v173_v55 = vmul.f32 %v171_v53, %v157_v52 }
 0x1a2   :  { %337 = vmatprep.mubr.msk.f32.mxu1 %vm32_vm0, %v173_v55 }
 0x1a3   :  { %338 = vmatmul.mubr.msk.f32.vlgmr.msra.gmra.mrb[0].mxu1 %vm32_vm0, %v174_v56 }
 0x276   :  { %v339_v59 = vpop.f32.mrb[0].mxu1 }
 0x277   :  { %v263_v60 = vadd.f32 %v339_v59, %v176_v57  ;;  %v253_v61 = vpop.f32.mrb[1].mxu1 }
 0x278   :  { %v262_v62 = vadd.f32 %v253_v61, %v175_v58 }
 0x279   :  { %266 = vst.msk [vmem:[#allocation3 + $0x8] sm:$0xff] %vm59_vm1, %v263_v60 }
 0x27a   :  { %265 = vst.msk [vmem:[#allocation3] sm:$0xff] %vm59_vm1, %v262_v62 }
 0x280   :  { %v271_v0 = vld [vmem:[#allocation3 + $0x8] sm:$0xff] }
 0x281   :  { %v270_v1 = vld [vmem:[#allocation3] sm:$0xff]  ;;  %v280_v2 = vadd.f32 %v305_v63, %v271_v0 }
 0x282   :  { %v279_v3 = vadd.f32 %v305_v63, %v270_v1 }
 0x283   :  { %282 = vst.msk [vmem:[#allocation4 + $0x8] sm:$0xff] %vm59_vm1, %v280_v2 }
 0x284   :  { %281 = vst.msk [vmem:[#allocation4] sm:$0xff] %vm59_vm1, %v279_v3 }
 0x285   :  { %379 = shalt.err (!%p376_p4)
}
 0x286   :  { %s380_s22 = scalar_lea.hbm %s502_s6, 256 }
 0x287   :  { %p381_p5 = scmp.ne.s32.totalorder %s502_s6, %s380_s22  ;;  %p384_p6 = scmp.lt.u32.totalorder %s380_s22, %s502_s6 }
 0x289   :  { %p386_p7 = pnand %p384_p6, %p381_p5 }
 0x28b   :  { %389 = shalt.err (!%p386_p7)
}
 0x28c   :  { %s394_s27 = smov 128   ;;  %s395_s28 = smov 8  }
 0x28d   :  { %294 = dma.vmem_to_hbm [thread:$0]  %s289_s19, 256, %s502_s6, [#allocation5], %s394_s27, %s394_s27, %s395_s28  }
 0x28e   :  { %390 = dma.done.wait [#allocation5], 256  }
 0x28f   :  { %391 = vsyncadd [#allocation5], 4294967040 }
 0x290   :  { %298 = vsyncpa [#allocation5], 1 }

</bundles_post_ra>
